<compile_context>
chip_gen: v5e
topology: v5e:2x2
jax: 0.10.0
libtpu: 0.0.40
codegen_flags: <defaults>
</compile_context>

<pallas_src>
import functools

import jax
import jax.numpy as jnp
from jax.experimental import pallas as pl
from jax.experimental.pallas import tpu as pltpu


def _round_up(x, m):
    return (x + m - 1) // m * m


def _largest_divisor(n, cap, step):
    """Largest multiple of `step` that divides n and is <= cap (falls back to step)."""
    best = step
    d = step
    while d <= min(cap, n):
        if n % d == 0:
            best = d
        d += step
    return best


# ---------------------------------------------------------------------------
# Kernel 1 (prologue, row-tiled): one fused dot X @ [W1 | fc_W], split into
# XW1 (bf16, feeds the A-matmul) and seq_fts (f32 output of the module).
# ---------------------------------------------------------------------------
def _prologue_kernel(x_ref, w_ref, xw1_ref, seq_ref, *, hid_p):
    y = jnp.dot(x_ref[...], w_ref[...], preferred_element_type=jnp.float32)
    xw1_ref[...] = y[:, :hid_p].astype(xw1_ref.dtype)
    seq_ref[...] = y[:, hid_p:].astype(seq_ref.dtype)


# ---------------------------------------------------------------------------
# Kernel 2 (grid = (rows i, contraction k)): h = relu(A @ XW1 + b1), and in the
# finalize step the small RHS for pass 2: HW23 = h @ [W2 | W3] (f32 dot).
# A tiles are cast to bf16 in-kernel so f32 A can be streamed without a copy.
# ---------------------------------------------------------------------------
def _layer1_kernel(a_ref, xw1_ref, b1_ref, w23_ref, h_ref, hw23_ref, acc_ref):
    k = pl.program_id(1)

    @pl.when(k == 0)
    def _():
        acc_ref[...] = jnp.zeros_like(acc_ref)

    a = a_ref[...].astype(jnp.bfloat16)
    acc_ref[...] += jnp.dot(a, xw1_ref[...], preferred_element_type=jnp.float32)

    @pl.when(k == pl.num_programs(1) - 1)
    def _():
        h = jnp.maximum(acc_ref[...] + b1_ref[...], 0.0)
        h_ref[...] = h.astype(h_ref.dtype)
        hw23_ref[...] = jnp.dot(h, w23_ref[...],
                                preferred_element_type=jnp.float32
                                ).astype(hw23_ref.dtype)


# ---------------------------------------------------------------------------
# Kernel 3 (grid = (rows i, contraction k)): fused GraphConv layers 2 & 3
# (mean | log_std) = A @ HW23 + [b2 | b3], plus the reparameterization.
# ---------------------------------------------------------------------------
def _layer23_kernel(a_ref, hw23_ref, b23_ref, noise_ref, z_ref, acc_ref, *, out_p):
    k = pl.program_id(1)

    @pl.when(k == 0)
    def _():
        acc_ref[...] = jnp.zeros_like(acc_ref)

    a = a_ref[...].astype(jnp.bfloat16)
    acc_ref[...] += jnp.dot(a, hw23_ref[...], preferred_element_type=jnp.float32)

    @pl.when(k == pl.num_programs(1) - 1)
    def _():
        s = acc_ref[...] + b23_ref[...]
        mean = jnp.maximum(s[:, :out_p], 0.0)
        log_std = s[:, out_p:]
        z_ref[...] = (mean + noise_ref[...] * jnp.exp(log_std)).astype(z_ref.dtype)


# ---------------------------------------------------------------------------
# Wrapper
# ---------------------------------------------------------------------------
def gae_nc_forward(a_hat, features, params, noise, *, tm=None, tk=None):
    N, in_dim = features.shape
    hidden = params["w1"].shape[1]
    out_dim = params["w2"].shape[1]

    f32, bf16 = jnp.float32, jnp.bfloat16

    # --- pad feature widths to lane multiples (128) ---
    in_p = _round_up(in_dim, 128)
    hid_p = _round_up(hidden, 128)
    out_p = _round_up(out_dim, 128)

    # Pad N only to the lane quantum (128) -- never to a multiple of tk -- so the
    # bandwidth-dominant A traffic stays as close to N^2 as possible.
    n_p = _round_up(N, 128)

    # Tile selection: divisors of n_p (no tile-induced padding). Target tm<=512,
    # tk<=1024; keep the parallel row axis >= 2 tiles so both v7x TCs are used.
    if tm is None:
        tm_cap = min(512, n_p // 2) if n_p >= 256 else n_p
        tm = _largest_divisor(n_p, tm_cap, 64)
    if tk is None:
        tk = _largest_divisor(n_p, min(1024, n_p), 128)
    assert n_p % tm == 0 and n_p % tk == 0

    def pad2(x, r, c):
        if x.shape == (r, c):
            return x
        return jnp.pad(x, ((0, r - x.shape[0]), (0, c - x.shape[1])))

    # A: zero extra copies when N is lane-aligned (kernels cast tiles to bf16 on the
    # fly); otherwise fuse the pad with a bf16 cast so the one padded copy and both
    # kernel reads are half-width.
    if N == n_p:
        a_in = a_hat
    else:
        a_in = pad2(a_hat, n_p, n_p).astype(bf16)

    x_p = pad2(features, n_p, in_p).astype(f32)
    w1fc_p = jnp.concatenate(
        [pad2(params["w1"], in_p, hid_p), pad2(params["fc_w"], in_p, hid_p)],
        axis=1).astype(f32)                                         # (in_p, 2*hid_p)
    b1_p = pad2(params["b1"].reshape(1, -1), 1, hid_p).astype(f32)
    w23_p = jnp.concatenate(
        [pad2(params["w2"], hid_p, out_p), pad2(params["w3"], hid_p, out_p)],
        axis=1).astype(f32)                                         # (hid_p, 2*out_p)
    b23_p = jnp.concatenate(
        [pad2(params["b2"].reshape(1, -1), 1, out_p),
         pad2(params["b3"].reshape(1, -1), 1, out_p)], axis=1).astype(f32)
    noise_p = pad2(noise, n_p, out_p).astype(f32)

    # --- pass 0: [XW1 | seq_fts] = X @ [W1 | fc_W] (row-tiled, no A dependence) ---
    xw1_p, seq_p = pl.pallas_call(
        functools.partial(_prologue_kernel, hid_p=hid_p),
        grid=(n_p // tm,),
        in_specs=[
            pl.BlockSpec((tm, in_p), lambda i: (i, 0)),
            pl.BlockSpec((in_p, 2 * hid_p), lambda i: (0, 0)),
        ],
        out_specs=[
            pl.BlockSpec((tm, hid_p), lambda i: (i, 0)),
            pl.BlockSpec((tm, hid_p), lambda i: (i, 0)),
        ],
        out_shape=[
            jax.ShapeDtypeStruct((n_p, hid_p), bf16),
            jax.ShapeDtypeStruct((n_p, hid_p), f32),
        ],
        compiler_params=pltpu.CompilerParams(dimension_semantics=("parallel",)),
    )(x_p, w1fc_p)

    grid = (n_p // tm, n_p // tk)
    cparams = pltpu.CompilerParams(
        dimension_semantics=("parallel", "arbitrary"))

    a_bytes = int(n_p) * int(n_p) * jnp.dtype(a_in.dtype).itemsize

    # --- pass 1: h = relu(A @ XW1 + b1), plus HW23 = h @ [W2 | W3] ---
    cost1 = pl.CostEstimate(
        flops=2 * n_p * n_p * hid_p + 2 * n_p * hid_p * 2 * out_p,
        transcendentals=0,
        bytes_accessed=a_bytes + n_p * hid_p * (2 + 4) + n_p * 2 * out_p * 2)

    h_p, hw23_p = pl.pallas_call(
        _layer1_kernel,
        grid=grid,
        in_specs=[
            pl.BlockSpec((tm, tk), lambda i, k: (i, k)),            # A tile
            pl.BlockSpec((tk, hid_p), lambda i, k: (k, 0)),         # XW1 (contraction rows)
            pl.BlockSpec((1, hid_p), lambda i, k: (0, 0)),          # b1
            pl.BlockSpec((hid_p, 2 * out_p), lambda i, k: (0, 0)),  # W23 (f32 resident)
        ],
        out_specs=[
            pl.BlockSpec((tm, hid_p), lambda i, k: (i, 0)),
            pl.BlockSpec((tm, 2 * out_p), lambda i, k: (i, 0)),
        ],
        out_shape=[
            jax.ShapeDtypeStruct((n_p, hid_p), f32),
            jax.ShapeDtypeStruct((n_p, 2 * out_p), bf16),
        ],
        scratch_shapes=[pltpu.VMEM((tm, hid_p), f32)],
        compiler_params=cparams,
        cost_estimate=cost1,
    )(a_in, xw1_p, b1_p, w23_p)

    # --- pass 2: [mean | log_std] = A @ HW23 + [b2 | b3]; z = mean + noise*exp(log_std) ---
    cost2 = pl.CostEstimate(
        flops=2 * n_p * n_p * 2 * out_p,
        transcendentals=n_p * out_p,
        bytes_accessed=a_bytes + n_p * 2 * out_p * 2 + n_p * out_p * (4 + 4))

    z_p = pl.pallas_call(
        functools.partial(_layer23_kernel, out_p=out_p),
        grid=grid,
        in_specs=[
            pl.BlockSpec((tm, tk), lambda i, k: (i, k)),            # A tile
            pl.BlockSpec((tk, 2 * out_p), lambda i, k: (k, 0)),     # HW23
            pl.BlockSpec((1, 2 * out_p), lambda i, k: (0, 0)),      # b2|b3
            pl.BlockSpec((tm, out_p), lambda i, k: (i, 0)),         # noise
        ],
        out_specs=pl.BlockSpec((tm, out_p), lambda i, k: (i, 0)),
        out_shape=jax.ShapeDtypeStruct((n_p, out_p), f32),
        scratch_shapes=[pltpu.VMEM((tm, 2 * out_p), f32)],
        compiler_params=cparams,
        cost_estimate=cost2,
    )(a_in, hw23_p, b23_p, noise_p)

    z = z_p[:N, :out_dim]
    h = h_p[:N, :hidden]
    seq_fts = seq_p[:N, :hidden]
    return z, h, seq_fts


def build_normalized_adjacency(key, n, p_edge=0.1):
    # deterministic random undirected graph, then DGL 'both' normalization
    a = (jax.random.uniform(key, (n, n)) < p_edge).astype(jnp.float32)
    a = jnp.maximum(a, a.T)
    a = a * (1.0 - jnp.eye(n, dtype=jnp.float32))     # no self loops (DGL GraphConv doesn't add them)
    deg_out = jnp.maximum(a.sum(axis=0), 1.0)         # out-degree of src, clamped >= 1
    deg_in = jnp.maximum(a.sum(axis=1), 1.0)          # in-degree of dst, clamped >= 1
    a_hat = (deg_in[:, None] ** -0.5) * a * (deg_out[None, :] ** -0.5)
    return a_hat.astype(jnp.float32)


if __name__ == "__main__":
    # N=640 is a multiple of 128 -> no padded copy of A; tm=320, tk=640 -> grid (2, 1)
    N, in_dim, hidden_dim, out_dim = 640, 16, 64, 32

    key = jax.random.PRNGKey(0)
    keys = jax.random.split(key, 8)

    a_hat = build_normalized_adjacency(keys[0], N)
    features = jax.random.normal(keys[1], (N, in_dim), dtype=jnp.float32)

    scale = 0.2
    params = {
        "w1": scale * jax.random.normal(keys[2], (in_dim, hidden_dim), dtype=jnp.float32),
        "b1": jnp.zeros((hidden_dim,), dtype=jnp.float32),
        "w2": scale * jax.random.normal(keys[3], (hidden_dim, out_dim), dtype=jnp.float32),
        "b2": jnp.zeros((out_dim,), dtype=jnp.float32),
        "w3": scale * jax.random.normal(keys[4], (hidden_dim, out_dim), dtype=jnp.float32),
        "b3": jnp.zeros((out_dim,), dtype=jnp.float32),
        # torch Linear weight is (hidden, in); we store its transpose (in, hidden)
        "fc_w": scale * jax.random.normal(keys[5], (in_dim, hidden_dim), dtype=jnp.float32),
    }

    # gaussian_noise from encoder_VGAE (torch.randn(N, out_dim)); fixed for determinism
    noise = jax.random.normal(keys[6], (N, out_dim), dtype=jnp.float32)

    z, h, seq_fts = gae_nc_forward(a_hat, features, params, noise)
    jax.block_until_ready((z, h, seq_fts))

    assert z.shape == (N, out_dim) and h.shape == (N, hidden_dim) and seq_fts.shape == (N, hidden_dim)

    # pure-f32 JAX reference (true module semantics); kernel uses bf16 A-matmul operands,
    # so compare with a tolerance that covers bf16 rounding.
    h_ref = jnp.maximum(a_hat @ (features @ params["w1"]) + params["b1"], 0.0)
    mean_ref = jnp.maximum(a_hat @ (h_ref @ params["w2"]) + params["b2"], 0.0)
    log_std_ref = a_hat @ (h_ref @ params["w3"]) + params["b3"]
    z_ref = mean_ref + noise * jnp.exp(log_std_ref)
    seq_ref = features @ params["fc_w"]

    assert jnp.allclose(h, h_ref, atol=1e-2, rtol=1e-2), "h mismatch"
    assert jnp.allclose(z, z_ref, atol=1e-2, rtol=1e-2), "z mismatch"
    assert jnp.allclose(seq_fts, seq_ref, atol=1e-4, rtol=1e-4), "seq_fts mismatch"

    print("KERNEL_OK")
</pallas_src>

<mosaic_0001>
module attributes {stable_mosaic.version = 11 : i64} {
  func.func @_prologue_kernel(%arg0: i32, %arg1: memref<320x128xf32, #tpu.memory_space<vmem>>, %arg2: memref<128x256xf32, #tpu.memory_space<vmem>>, %arg3: memref<320x128xbf16, #tpu.memory_space<vmem>>, %arg4: memref<320x128xf32, #tpu.memory_space<vmem>>) attributes {dimension_semantics = [#tpu.dimension_semantics<parallel>], iteration_bounds = array<i64: 2>, scalar_prefetch = 0 : i64, scratch_operands = 0 : i64, tpu.core_type = #tpu.core_type<tc>, window_params = [{transform_indices = @transform_0, window_bounds = array<i64: 320, 128>}, {pipeline_mode = #tpu.pipeline_mode<synchronous>, transform_indices = @transform_1, window_bounds = array<i64: 128, 256>}, {transform_indices = @transform_2, window_bounds = array<i64: 320, 128>}, {transform_indices = @transform_3, window_bounds = array<i64: 320, 128>}]} {
    %c0 = arith.constant 0 : index
    %c0_0 = arith.constant 0 : index
    %0 = vector.load %arg1[%c0, %c0_0] : memref<320x128xf32, #tpu.memory_space<vmem>>, vector<320x128xf32>
    %c0_1 = arith.constant 0 : index
    %c0_2 = arith.constant 0 : index
    %1 = vector.load %arg2[%c0_1, %c0_2] : memref<128x256xf32, #tpu.memory_space<vmem>>, vector<128x256xf32>
    %cst = arith.constant dense<0.000000e+00> : vector<320x256xf32>
    %2 = tpu.matmul %0, %1, %cst {dimension_numbers = #tpu.dot_dimension_numbers<[1], [0], [0], [1], [0, 0, 1, 1], [], []>} : vector<320x128xf32>, vector<128x256xf32>, vector<320x256xf32> -> vector<320x256xf32>
    %3 = vector.extract_strided_slice %2 {offsets = [0, 0], sizes = [320, 128], strides = [1, 1]} : vector<320x256xf32> to vector<320x128xf32>
    %4 = arith.truncf %3 : vector<320x128xf32> to vector<320x128xbf16>
    %c0_3 = arith.constant 0 : index
    %c0_4 = arith.constant 0 : index
    %5 = vector.load %arg3[%c0_3, %c0_4] : memref<320x128xbf16, #tpu.memory_space<vmem>>, vector<320x128xbf16>
    tpu.vector_store %arg3[%c0_3, %c0_4], %4 {strides = array<i32>} : memref<320x128xbf16, #tpu.memory_space<vmem>>, vector<320x128xbf16>,
    %6 = vector.extract_strided_slice %2 {offsets = [0, 128], sizes = [320, 128], strides = [1, 1]} : vector<320x256xf32> to vector<320x128xf32>
    %c0_5 = arith.constant 0 : index
    %c0_6 = arith.constant 0 : index
    %7 = vector.load %arg4[%c0_5, %c0_6] : memref<320x128xf32, #tpu.memory_space<vmem>>, vector<320x128xf32>
    tpu.vector_store %arg4[%c0_5, %c0_6], %6 {strides = array<i32>} : memref<320x128xf32, #tpu.memory_space<vmem>>, vector<320x128xf32>,
    return
  }
  func.func @transform_0(%arg0: i32) -> (i32, i32) {
    %c0_i32 = arith.constant 0 : i32
    %c0_i32_0 = arith.constant 0 : i32
    return %arg0, %c0_i32 : i32, i32
  }
  func.func @transform_1(%arg0: i32) -> (i32, i32) {
    %c0_i32 = arith.constant 0 : i32
    %c0_i32_0 = arith.constant 0 : i32
    %c0_i32_1 = arith.constant 0 : i32
    return %c0_i32, %c0_i32_0 : i32, i32
  }
  func.func @transform_2(%arg0: i32) -> (i32, i32) {
    %c0_i32 = arith.constant 0 : i32
    %c0_i32_0 = arith.constant 0 : i32
    return %arg0, %c0_i32 : i32, i32
  }
  func.func @transform_3(%arg0: i32) -> (i32, i32) {
    %c0_i32 = arith.constant 0 : i32
    %c0_i32_0 = arith.constant 0 : i32
    return %arg0, %c0_i32 : i32, i32
  }
}

</mosaic_0001>

<bundles_post_ra>
// kernel: tpu_custom_call.1
= control target key start
LH: loop header
LB: loop body
LE: loop exit
PB: predicated region body
PF: predicated region fallthrough
CT: control target
= control target key end

     0   :  { %9 = vsyncpa [#allocation3], 0  ;;  %s1549_s0 = inlined_call_operand.hbm [shape: f32[640,128], index: 0, kind: input, shape index: {}]   ;;  %s1550_s1 = inlined_call_operand.hbm [shape: f32[128,256], index: 1, kind: input, shape index: {}]   ;;  %s1551_s2 = inlined_call_operand.hbm [shape: bf16[640,128], index: 2, kind: output, shape index: {0}]   ;;  %s1552_s3 = inlined_call_operand.hbm [shape: f32[640,128], index: 3, kind: output, shape index: {1}]  }
   0x1   :  { %11 = vsyncpa [#allocation3 + $0x1], 0 }
   0x2   :  { %12 = vsyncpa [#allocation6], 0 }
   0x3   :  { %13 = vsyncpa [#allocation4], 0 }
   0x4   :  { %15 = vsyncpa [#allocation4 + $0x1], 0 }
   0x5   :  { %16 = vsyncpa [#allocation9], 0 }
   0x6   :  { %18 = vsyncpa [#allocation9 + $0x1], 0  ;;  %s1273_s12 = smov 0   ;;  %s1275_s13 = smov 0  }
   0x7   :  { %s1277_s14 = smov 0   ;;  %s1279_s15 = smov 0  }
   0x8 LB: > { %s1294_s16 = sadd.s32 4294967295, %s1242_s15   ;;  %s842_s17 = sadd.s32 4294967294, %s1242_s15   ;;  %s1242_s15 = sphi %s1279_s15, %s1562_s15   ;;  %s1238_s14 = sphi %s1277_s14, %s1561_s14   ;;  %s1234_s13 = sphi %s1275_s13, %s1560_s13   ;;  %s1230_s12 = sphi %s1273_s12, %s1559_s12  }
   0x9   : > { %p44_p0 = scmp.ne.s32.totalorder %s1234_s13, %s1230_s12  ;;  %p45_p1 = scmp.eq.s32.totalorder %s1294_s16, 0 }
   0xa   : > { %p89_p2 = scmp.eq.s32.totalorder %s1294_s16, 1  ;;  %p95_p3 = scmp.eq.s32.totalorder %s842_s17, 1 }
   0xb   : > { %p1303_p4 = por %p45_p1, %p44_p0  ;;  %p843_p5 = scmp.ge.s32.totalorder %s1242_s15, 1 }
   0xc   : > { %p1308_p6 = por %p95_p3, %p44_p0  ;;  %p128_p7 = scmp.lt.s32.totalorder %s1242_s15, 3 }
   0xd   : > { %s139_s22 = sshll.u32 %s1550_s1, 4  ;;  %s1244_s24 = smov [#allocation5]   ;;  %s140_s22 = int_to_ptr.hbm [resolvable:$true] %s139_s22 }
   0xe   : > { %p1316_p8 = pnand %p843_p5, %p128_p7  ;;  %s141_s25 = sshll.u32 %s1244_s24, 4  ;;  %s142_s25 = int_to_ptr.vmem [resolvable:$true] %s141_s25 }
   0xf   : > { %s1326_s26 = sadd.s32 1, %s1242_s15   ;;  %s1245_s27 = smov 256  }
  0x10   : > { %p1020_p9 = pneg %p1316_p8  ;;  %s1246_s28 = smov 16  }
  0x11   : > { %s28_s29 = ssub.s32 %s1242_s15, %s1326_s26  ;;  %s31_s30 = sadd.s32 1, %s1238_s14 }
  0x12   : > { %p1021_p10 = pnand %p1020_p9, %p45_p1  ;;  %p29_p12 = scmp.eq.s32.totalorder %s28_s29, 0 }
  0x13   : > { %p38_p13 = scmp.ne.s32.totalorder %s1238_s14, %s1234_s13  ;;  %p39_p0 = scmp.eq.s32.totalorder %s1242_s15, 0 }
  0x14   : > { %1023 = dma.hbm_to_vmem [thread:$0]  (!%p1021_p10), %s140_s22, 4096, %s142_s25, [#allocation6], %s1245_s27, %s1245_s27, %s1246_s28  }
  0x15   : > { %p1036_p3 = scmp.lt.s32.totalorder %s1242_s15, 2  ;;  %p40_p5 = por %p39_p0, %p38_p13 }
  0x16   : > { %s1336_s4 = scalar_select %p29_p12, %s1238_s14, %s31_s30  }
  0x17   : > { %p1340_p7 = por %p89_p2, %p38_p13  ;;  %s155_s6 = sand.u32 1, %s1238_s14  }
  0x18   : > { %s853_s7 = smul.u32 320, %s1242_s15  ;;  %p1349_p9 = pnand %p1036_p3, %p40_p5 }
  0x19   : > { %s1007_s8 = smul.u32 320, %s155_s6  ;;  %s156_s24 = scalar_lea.sflag [#allocation3], %s155_s6 }
  0x1a   : > { %s164_s11 = scalar_lea.hbm %s1549_s0, %s853_s7  ;;  %p1114_p10 = pneg %p1349_p9 }
  0x1b   : > { %s165_s20 = sshll.u32 %s164_s11, 4  ;;  %s159_s21 = scalar_lea.vmem [#allocation2], %s1007_s8  ;;  %s166_s20 = int_to_ptr.hbm [resolvable:$true] %s165_s20 }
  0x1c   : > { %s167_s22 = sshll.u32 %s159_s21, 4  ;;  %s1110_s25 = sshra.s32 %s166_s20, 4  ;;  %s168_s22 = int_to_ptr.vmem [resolvable:$true] %s167_s22  ;;  %s1111_s25 = int_to_ptr.hbm [resolvable:$true] %s1110_s25 }
  0x1d   : > { %s1112_s27 = scalar_lea.hbm %s1111_s25, 320  ;;  %s1117_s30 = scalar_lea.hbm %s1549_s0, 640 }
  0x1e   : > { %p1113_p2 = scmp.ne.s32.totalorder %s1111_s25, %s1112_s27  ;;  %p1118_p0 = scmp.lt.s32.totalorder %s1111_s25, %s1549_s0 }
  0x1f   : > { %p1119_p3 = scmp.lt.s32.totalorder %s1117_s30, %s1112_s27 }
  0x20   : > { %p1115_p12 = pnand %p1114_p10, %p1113_p2 }
  0x21   : > { %p1120_p5 = por %p1119_p3, %p1118_p0 }
  0x22   : > { %p1116_p13 = pneg %p1115_p12 }
  0x24   : > { %p1121_p11 = pnand %p1120_p5, %p1116_p13 }
  0x26   : > { %1124 = shalt.err (!%p1121_p11)
}
  0x27   : > { %s1247_s6 = smov 128   ;;  %s1248_s8 = smov 8  }
  0x28   : > { %1027 = dma.hbm_to_vmem [thread:$0]  (!%p1349_p9), %s166_s20, 5120, %s168_s22, %s156_s24, %s1247_s6, %s1247_s6, %s1248_s8  }
  0x29   : > { %179 = sbr.rel (%p1316_p8) target bundleno = 385 (0x181), region = 28  ;;  %s1366_s10 = sand.u32 (!%p1316_p8), 1, %s1234_s13  }
  0x2a   : > { %s1008_s11 = smul.u32 (!%p1316_p8), 320, %s1366_s10  ;;  %s182_s21 = scalar_lea.sflag (!%p1316_p8), [#allocation3], %s1366_s10 }
  0x2c   : > { %s1372_s25 = scalar_lea.vmem (!%p1316_p8), [#allocation2], %s1008_s11 }
  0x2e   : > { %1213 = dma.done.wait (%p1303_p4), %s182_s21, 5120  }
  0x2f   : > { %1215 = vsyncadd (%p1303_p4), %s182_s21, 4294962176 }
  0x30   : > { %1217 = dma.done.wait (%p45_p1), [#allocation6], 4096  }
  0x31   : > { %1219 = vsyncadd (%p45_p1), [#allocation6], 4294963200  ;;  %v292_v0 = vld [vmem:[#allocation5 + $0xf0] sm:$0xff]  ;;  %v290_v1 = vld [vmem:[#allocation5 + $0xe0] sm:$0xff]  ;;  %s1418_s18 = scalar_lea.vmem [#allocation8], %s1008_s11  ;;  %s1009_s23 = smul.u32 160, %s1366_s10 }
  0x32   : > { %v293_v2 = vld [vmem:[#allocation5 + $0xf8] sm:$0xff]  ;;  %294 = vmatpush.msra.mxu0 %v292_v0  ;;  %975 = vmatpush.msra.mxu2 %v292_v0  ;;  %v291_v3 = vld [vmem:[#allocation5 + $0xe8] sm:$0xff]  ;;  %v288_v4 = vld [vmem:[#allocation5 + $0xd0] sm:$0xff]  ;;  %s854_s20 = smul.u32 160, %s1294_s16  ;;  %s689_s11 = scalar_lea.sflag [#allocation4], %s1366_s10 }
  0x33   : > { %991 = vmatpush.msra.mxu3 %v293_v2  ;;  %431 = vmatpush.msra.mxu1 %v293_v2  ;;  %v289_v5 = vld [vmem:[#allocation5 + $0xd8] sm:$0xff]  ;;  %v286_v6 = vld [vmem:[#allocation5 + $0xc0] sm:$0xff]  ;;  %v287_v7 = vld [vmem:[#allocation5 + $0xc8] sm:$0xff]  ;;  %s1425_s17 = scalar_lea.vmem [#allocation7], %s1009_s23  ;;  %s855_s22 = smul.u32 320, %s1294_s16 }
  0x34   : > { %295 = vmatpush.msra.mxu0 %v290_v1  ;;  %976 = vmatpush.msra.mxu2 %v290_v1  ;;  %v284_v8 = vld [vmem:[#allocation5 + $0xb0] sm:$0xff]  ;;  %v285_v9 = vld [vmem:[#allocation5 + $0xb8] sm:$0xff]  ;;  %v282_v10 = vld [vmem:[#allocation5 + $0xa0] sm:$0xff]  ;;  %s705_s28 = scalar_lea.hbm %s1551_s2, %s854_s20  ;;  %s706_s29 = sshll.u32 %s1425_s17, 4  ;;  %s1496_s29 = int_to_ptr.vmem [resolvable:$true] %s706_s29 }
  0x35   : > { %992 = vmatpush.msra.mxu3 %v291_v3  ;;  %432 = vmatpush.msra.mxu1 %v291_v3  ;;  %v283_v11 = vld [vmem:[#allocation5 + $0xa8] sm:$0xff]  ;;  %v280_v12 = vld [vmem:[#allocation5 + $0x90] sm:$0xff]  ;;  %v281_v13 = vld [vmem:[#allocation5 + $0x98] sm:$0xff]  ;;  %s722_s9 = scalar_lea.hbm %s1552_s3, %s855_s22  ;;  %s708_s6 = sshll.u32 %s705_s28, 4  ;;  %s709_s6 = int_to_ptr.hbm [resolvable:$true] %s708_s6 }
  0x36   : > { %296 = vmatpush.msra.mxu0 %v288_v4  ;;  %977 = vmatpush.msra.mxu2 %v288_v4  ;;  %v278_v14 = vld [vmem:[#allocation5 + $0x80] sm:$0xff]  ;;  %v279_v15 = vld [vmem:[#allocation5 + $0x88] sm:$0xff]  ;;  %v276_v16 = vld [vmem:[#allocation5 + $0x70] sm:$0xff]  ;;  %s723_s16 = sshll.u32 %s1418_s18, 4  ;;  %s725_s8 = sshll.u32 %s722_s9, 4  ;;  %s1499_s16 = int_to_ptr.vmem [resolvable:$true] %s723_s16  ;;  %s1501_s8 = int_to_ptr.hbm [resolvable:$true] %s725_s8 }
  0x37   : > { %993 = vmatpush.msra.mxu3 %v289_v5  ;;  %433 = vmatpush.msra.mxu1 %v289_v5  ;;  %v277_v17 = vld [vmem:[#allocation5 + $0x78] sm:$0xff]  ;;  %v274_v18 = vld [vmem:[#allocation5 + $0x60] sm:$0xff]  ;;  %v275_v19 = vld [vmem:[#allocation5 + $0x68] sm:$0xff]  ;;  %s1154_s21 = sshra.s32 %s709_s6, 4  ;;  %s1160_s22 = scalar_lea.hbm %s1551_s2, 320  ;;  %s1155_s21 = int_to_ptr.hbm [resolvable:$true] %s1154_s21 }
  0x38   : > { %297 = vmatpush.msra.mxu0 %v286_v6  ;;  %978 = vmatpush.msra.mxu2 %v286_v6  ;;  %v272_v20 = vld [vmem:[#allocation5 + $0x50] sm:$0xff]  ;;  %v273_v21 = vld [vmem:[#allocation5 + $0x58] sm:$0xff]  ;;  %v270_v22 = vld [vmem:[#allocation5 + $0x40] sm:$0xff]  ;;  %p1161_p11 = scmp.lt.s32.totalorder %s1155_s21, %s1551_s2 }
  0x39   : > { %994 = vmatpush.msra.mxu3 %v287_v7  ;;  %434 = vmatpush.msra.mxu1 %v287_v7  ;;  %v271_v23 = vld [vmem:[#allocation5 + $0x48] sm:$0xff]  ;;  %v268_v24 = vld [vmem:[#allocation5 + $0x30] sm:$0xff]  ;;  %v269_v25 = vld [vmem:[#allocation5 + $0x38] sm:$0xff] }
  0x3a   : > { %298 = vmatpush.msra.mxu0 %v284_v8  ;;  %979 = vmatpush.msra.mxu2 %v284_v8  ;;  %v266_v26 = vld [vmem:[#allocation5 + $0x20] sm:$0xff]  ;;  %v267_v27 = vld [vmem:[#allocation5 + $0x28] sm:$0xff]  ;;  %v264_v28 = vld [vmem:[#allocation5 + $0x10] sm:$0xff] }
  0x3b   : > { %995 = vmatpush.msra.mxu3 %v285_v9  ;;  %435 = vmatpush.msra.mxu1 %v285_v9  ;;  %v265_v29 = vld [vmem:[#allocation5 + $0x18] sm:$0xff]  ;;  %v262_v30 = vld [vmem:[#allocation5] sm:$0xff]  ;;  %v263_v33 = vld [vmem:[#allocation5 + $0x8] sm:$0xff] }
  0x3c   : > { %299 = vmatpush.msra.mxu0 %v282_v10  ;;  %980 = vmatpush.msra.mxu2 %v282_v10  ;;  %v222_v31 = vld [vmem:[%s1372_s25] sm:$0xff]  ;;  %v223_v34 = vld [vmem:[%s1372_s25 + $0x8] sm:$0xff]  ;;  %v224_v36 = vld [vmem:[%s1372_s25 + $0x10] sm:$0xff] }
  0x3d   : > { %996 = vmatpush.msra.mxu3 %v283_v11  ;;  %436 = vmatpush.msra.mxu1 %v283_v11  ;;  %v242_v32 = vld [vmem:[%s1372_s25 + $0xa0] sm:$0xff]  ;;  %v243_v35 = vld [vmem:[%s1372_s25 + $0xa8] sm:$0xff]  ;;  %v244_v37 = vld [vmem:[%s1372_s25 + $0xb0] sm:$0xff] }
  0x3e   : > { %300 = vmatpush.msra.mxu0 %v280_v12  ;;  %981 = vmatpush.msra.mxu2 %v280_v12  ;;  %v225_v38 = vld [vmem:[%s1372_s25 + $0x18] sm:$0xff]  ;;  %v226_v40 = vld [vmem:[%s1372_s25 + $0x20] sm:$0xff]  ;;  %v227_v42 = vld [vmem:[%s1372_s25 + $0x28] sm:$0xff] }
  0x3f   : > { %997 = vmatpush.msra.mxu3 %v281_v13  ;;  %437 = vmatpush.msra.mxu1 %v281_v13  ;;  %v245_v39 = vld [vmem:[%s1372_s25 + $0xb8] sm:$0xff]  ;;  %v246_v41 = vld [vmem:[%s1372_s25 + $0xc0] sm:$0xff]  ;;  %v247_v43 = vld [vmem:[%s1372_s25 + $0xc8] sm:$0xff] }
  0x40   : > { %301 = vmatpush.msra.mxu0 %v278_v14  ;;  %982 = vmatpush.msra.mxu2 %v278_v14  ;;  %v228_v44 = vld [vmem:[%s1372_s25 + $0x30] sm:$0xff]  ;;  %v229_v46 = vld [vmem:[%s1372_s25 + $0x38] sm:$0xff]  ;;  %v230_v48 = vld [vmem:[%s1372_s25 + $0x40] sm:$0xff] }
  0x41   : > { %998 = vmatpush.msra.mxu3 %v279_v15  ;;  %438 = vmatpush.msra.mxu1 %v279_v15  ;;  %v248_v45 = vld [vmem:[%s1372_s25 + $0xd0] sm:$0xff]  ;;  %v249_v47 = vld [vmem:[%s1372_s25 + $0xd8] sm:$0xff]  ;;  %v250_v49 = vld [vmem:[%s1372_s25 + $0xe0] sm:$0xff] }
  0x42   : > { %302 = vmatpush.msra.mxu0 %v276_v16  ;;  %983 = vmatpush.msra.mxu2 %v276_v16  ;;  %v231_v50 = vld [vmem:[%s1372_s25 + $0x48] sm:$0xff]  ;;  %v232_v52 = vld [vmem:[%s1372_s25 + $0x50] sm:$0xff]  ;;  %v233_v54 = vld [vmem:[%s1372_s25 + $0x58] sm:$0xff] }
  0x43   : > { %999 = vmatpush.msra.mxu3 %v277_v17  ;;  %439 = vmatpush.msra.mxu1 %v277_v17  ;;  %v251_v51 = vld [vmem:[%s1372_s25 + $0xe8] sm:$0xff]  ;;  %v252_v53 = vld [vmem:[%s1372_s25 + $0xf0] sm:$0xff]  ;;  %v253_v55 = vld [vmem:[%s1372_s25 + $0xf8] sm:$0xff] }
  0x44   : > { %303 = vmatpush.msra.mxu0 %v274_v18  ;;  %984 = vmatpush.msra.mxu2 %v274_v18  ;;  %v234_v56 = vld [vmem:[%s1372_s25 + $0x60] sm:$0xff]  ;;  %v235_v58 = vld [vmem:[%s1372_s25 + $0x68] sm:$0xff]  ;;  %v236_v60 = vld [vmem:[%s1372_s25 + $0x70] sm:$0xff] }
  0x45   : > { %1000 = vmatpush.msra.mxu3 %v275_v19  ;;  %440 = vmatpush.msra.mxu1 %v275_v19  ;;  %v254_v57 = vld [vmem:[%s1372_s25 + $0x100] sm:$0xff]  ;;  %v255_v59 = vld [vmem:[%s1372_s25 + $0x108] sm:$0xff]  ;;  %v256_v61 = vld [vmem:[%s1372_s25 + $0x110] sm:$0xff] }
  0x46   : > { %304 = vmatpush.msra.mxu0 %v272_v20  ;;  %985 = vmatpush.msra.mxu2 %v272_v20  ;;  %v237_v62 = vld [vmem:[%s1372_s25 + $0x78] sm:$0xff]  ;;  %v238_v1 = vld [vmem:[%s1372_s25 + $0x80] sm:$0xff]  ;;  %v239_v7 = vld [vmem:[%s1372_s25 + $0x88] sm:$0xff] }
  0x47   : > { %1001 = vmatpush.msra.mxu3 %v273_v21  ;;  %441 = vmatpush.msra.mxu1 %v273_v21  ;;  %v257_v63 = vld [vmem:[%s1372_s25 + $0x118] sm:$0xff]  ;;  %v258_v2 = vld [vmem:[%s1372_s25 + $0x120] sm:$0xff]  ;;  %v259_v8 = vld [vmem:[%s1372_s25 + $0x128] sm:$0xff] }
  0x48   : > { %305 = vmatpush.msra.mxu0 %v270_v22  ;;  %986 = vmatpush.msra.mxu2 %v270_v22  ;;  %v240_v15 = vld [vmem:[%s1372_s25 + $0x90] sm:$0xff]  ;;  %v241_v21 = vld [vmem:[%s1372_s25 + $0x98] sm:$0xff] }
  0x49   : > { %1002 = vmatpush.msra.mxu3 %v271_v23  ;;  %442 = vmatpush.msra.mxu1 %v271_v23  ;;  %v260_v16 = vld [vmem:[%s1372_s25 + $0x130] sm:$0xff]  ;;  %v261_v22 = vld [vmem:[%s1372_s25 + $0x138] sm:$0xff]  ;;  %s1156_s25 = scalar_lea.hbm %s1155_s21, 160 }
  0x4a   : > { %306 = vmatpush.msra.mxu0 %v268_v24  ;;  %987 = vmatpush.msra.mxu2 %v268_v24  ;;  %p1157_p1 = scmp.ne.s32.totalorder %s1155_s21, %s1156_s25  ;;  %p1162_p9 = scmp.lt.s32.totalorder %s1160_s22, %s1156_s25 }
  0x4b   : > { %1003 = vmatpush.msra.mxu3 %v269_v25  ;;  %443 = vmatpush.msra.mxu1 %v269_v25 }
  0x4c   : > { %307 = vmatpush.msra.mxu0 %v266_v26  ;;  %988 = vmatpush.msra.mxu2 %v266_v26  ;;  %p1158_p4 = pnand %p1157_p1, %p1340_p7  ;;  %p1163_p2 = por %p1162_p9, %p1161_p11 }
  0x4d   : > { %1004 = vmatpush.msra.mxu3 %v267_v27  ;;  %444 = vmatpush.msra.mxu1 %v267_v27 }
  0x4e   : > { %308 = vmatpush.msra.mxu0 %v264_v28  ;;  %989 = vmatpush.msra.mxu2 %v264_v28  ;;  %p1159_p8 = pneg %p1158_p4 }
  0x4f   : > { %1005 = vmatpush.msra.mxu3 %v265_v29  ;;  %445 = vmatpush.msra.mxu1 %v265_v29 }
  0x50   : > { %309 = vmatpush.msra.mxu0 %v262_v30  ;;  %990 = vmatpush.msra.mxu2 %v262_v30  ;;  %p1164_p10 = pnand %p1163_p2, %p1159_p8 }
  0x51   : > { %310 = vmatmul.f32.vlgmr.msra.gmra.mxu0 %v222_v31  ;;  %370 = vmatmul.f32.vlgmr.msra.gmra.mxu2 %v242_v32 }
  0x52   : > { %1006 = vmatpush.msra.mxu3 %v263_v33  ;;  %446 = vmatpush.msra.mxu1 %v263_v33 }
  0x53   : > { %507 = vmatmul.f32.vlgmr.msra.gmra.mxu3 %v242_v32  ;;  %447 = vmatmul.f32.vlgmr.msra.gmra.mxu1 %v222_v31 }
  0x59   : > { %313 = vmatmul.f32.gmra.mxu0 %v223_v34  ;;  %373 = vmatmul.f32.gmra.mxu2 %v243_v35 }
  0x5b   : > { %510 = vmatmul.f32.gmra.mxu3 %v243_v35  ;;  %450 = vmatmul.f32.gmra.mxu1 %v223_v34 }
  0x61   : > { %316 = vmatmul.f32.gmra.mxu0 %v224_v36  ;;  %376 = vmatmul.f32.gmra.mxu2 %v244_v37 }
  0x63   : > { %513 = vmatmul.f32.gmra.mxu3 %v244_v37  ;;  %453 = vmatmul.f32.gmra.mxu1 %v224_v36 }
  0x69   : > { %319 = vmatmul.f32.gmra.mxu0 %v225_v38  ;;  %379 = vmatmul.f32.gmra.mxu2 %v245_v39 }
  0x6b   : > { %516 = vmatmul.f32.gmra.mxu3 %v245_v39  ;;  %456 = vmatmul.f32.gmra.mxu1 %v225_v38 }
  0x71   : > { %322 = vmatmul.f32.gmra.mxu0 %v226_v40  ;;  %382 = vmatmul.f32.gmra.mxu2 %v246_v41 }
  0x73   : > { %519 = vmatmul.f32.gmra.mxu3 %v246_v41  ;;  %459 = vmatmul.f32.gmra.mxu1 %v226_v40 }
  0x79   : > { %325 = vmatmul.f32.gmra.mxu0 %v227_v42  ;;  %385 = vmatmul.f32.gmra.mxu2 %v247_v43 }
  0x7b   : > { %522 = vmatmul.f32.gmra.mxu3 %v247_v43  ;;  %462 = vmatmul.f32.gmra.mxu1 %v227_v42 }
  0x81   : > { %328 = vmatmul.f32.gmra.mxu0 %v228_v44  ;;  %388 = vmatmul.f32.gmra.mxu2 %v248_v45 }
  0x83   : > { %525 = vmatmul.f32.gmra.mxu3 %v248_v45  ;;  %465 = vmatmul.f32.gmra.mxu1 %v228_v44 }
  0x89   : > { %331 = vmatmul.f32.gmra.mxu0 %v229_v46  ;;  %391 = vmatmul.f32.gmra.mxu2 %v249_v47 }
  0x8b   : > { %528 = vmatmul.f32.gmra.mxu3 %v249_v47  ;;  %468 = vmatmul.f32.gmra.mxu1 %v229_v46 }
  0x91   : > { %334 = vmatmul.f32.gmra.mxu0 %v230_v48  ;;  %394 = vmatmul.f32.gmra.mxu2 %v250_v49 }
  0x93   : > { %531 = vmatmul.f32.gmra.mxu3 %v250_v49  ;;  %471 = vmatmul.f32.gmra.mxu1 %v230_v48 }
  0x99   : > { %337 = vmatmul.f32.gmra.mxu0 %v231_v50  ;;  %397 = vmatmul.f32.gmra.mxu2 %v251_v51 }
  0x9b   : > { %534 = vmatmul.f32.gmra.mxu3 %v251_v51  ;;  %474 = vmatmul.f32.gmra.mxu1 %v231_v50 }
  0xa1   : > { %340 = vmatmul.f32.gmra.mxu0 %v232_v52  ;;  %400 = vmatmul.f32.gmra.mxu2 %v252_v53 }
  0xa3   : > { %537 = vmatmul.f32.gmra.mxu3 %v252_v53  ;;  %477 = vmatmul.f32.gmra.mxu1 %v232_v52 }
  0xa9   : > { %343 = vmatmul.f32.gmra.mxu0 %v233_v54  ;;  %403 = vmatmul.f32.gmra.mxu2 %v253_v55 }
  0xab   : > { %540 = vmatmul.f32.gmra.mxu3 %v253_v55  ;;  %480 = vmatmul.f32.gmra.mxu1 %v233_v54 }
  0xb1   : > { %346 = vmatmul.f32.gmra.mxu0 %v234_v56  ;;  %406 = vmatmul.f32.gmra.mxu2 %v254_v57 }
  0xb3   : > { %543 = vmatmul.f32.gmra.mxu3 %v254_v57  ;;  %483 = vmatmul.f32.gmra.mxu1 %v234_v56 }
  0xb9   : > { %349 = vmatmul.f32.gmra.mxu0 %v235_v58  ;;  %409 = vmatmul.f32.gmra.mxu2 %v255_v59 }
  0xbb   : > { %546 = vmatmul.f32.gmra.mxu3 %v255_v59  ;;  %486 = vmatmul.f32.gmra.mxu1 %v235_v58 }
  0xc1   : > { %352 = vmatmul.f32.gmra.mxu0 %v236_v60  ;;  %412 = vmatmul.f32.gmra.mxu2 %v256_v61 }
  0xc3   : > { %549 = vmatmul.f32.gmra.mxu3 %v256_v61  ;;  %489 = vmatmul.f32.gmra.mxu1 %v236_v60 }
  0xc9   : > { %355 = vmatmul.f32.gmra.mxu0 %v237_v62  ;;  %415 = vmatmul.f32.gmra.mxu2 %v257_v63 }
  0xcb   : > { %552 = vmatmul.f32.gmra.mxu3 %v257_v63  ;;  %492 = vmatmul.f32.gmra.mxu1 %v237_v62 }
  0xce   : > { %v311_v0 = vpop.f32.mrf.mxu0 }
  0xd0   : > { %v448_v3 = vpop.f32.mrf.mxu1 }
  0xd1   : > { %358 = vmatmul.f32.gmra.mxu0 %v238_v1  ;;  %418 = vmatmul.f32.gmra.mxu2 %v258_v2  ;;  %648 = vst [vmem:[%s1418_s18] sm:$0xff] %v448_v3 }
  0xd3   : > { %555 = vmatmul.f32.gmra.mxu3 %v258_v2  ;;  %495 = vmatmul.f32.gmra.mxu1 %v238_v1 }
  0xd4   : > { %v371_v4 = vpop.f32.mrf.mxu2 }
  0xd6   : > { %v314_v5 = vpop.f32.mrf.mxu0  ;;  %v508_v6 = vpop.f32.mrf.mxu3 }
  0xd7   : > { %v859_v9 = vpack.c.bf16 %v314_v5, %v311_v0  ;;  %668 = vst [vmem:[%s1418_s18 + $0xa0] sm:$0xff] %v508_v6 }
  0xd8   : > { %v451_v10 = vpop.f32.mrf.mxu1 }
  0xd9   : > { %860 = vst [vmem:[%s1425_s17] sm:$0xff] %v859_v9   ;;  %361 = vmatmul.f32.gmra.mxu0 %v239_v7  ;;  %421 = vmatmul.f32.gmra.mxu2 %v259_v8 }
  0xda   : > { %649 = vst [vmem:[%s1418_s18 + $0x8] sm:$0xff] %v451_v10 }
  0xdb   : > { %558 = vmatmul.f32.gmra.mxu3 %v259_v8  ;;  %498 = vmatmul.f32.gmra.mxu1 %v239_v7 }
  0xdc   : > { %v374_v11 = vpop.f32.mrf.mxu2 }
  0xdd   : > { %v909_v12 = vpack.c.bf16 %v374_v11, %v371_v4 }
  0xde   : > { %v317_v13 = vpop.f32.mrf.mxu0  ;;  %v511_v14 = vpop.f32.mrf.mxu3 }
  0xdf   : > { %965 = vst [vmem:[%s1425_s17 + $0x50] sm:$0xff] %v909_v12  }
  0xe0   : > { %669 = vst [vmem:[%s1418_s18 + $0xa8] sm:$0xff] %v511_v14  ;;  %v454_v17 = vpop.f32.mrf.mxu1 }
  0xe1   : > { %364 = vmatmul.f32.gmra.mxu0 %v240_v15  ;;  %424 = vmatmul.f32.gmra.mxu2 %v260_v16  ;;  %650 = vst [vmem:[%s1418_s18 + $0x10] sm:$0xff] %v454_v17 }
  0xe3   : > { %561 = vmatmul.f32.gmra.mxu3 %v260_v16  ;;  %501 = vmatmul.f32.gmra.mxu1 %v240_v15 }
  0xe4   : > { %v377_v18 = vpop.f32.mrf.mxu2 }
  0xe6   : > { %v320_v19 = vpop.f32.mrf.mxu0  ;;  %v514_v20 = vpop.f32.mrf.mxu3 }
  0xe7   : > { %v864_v23 = vpack.c.bf16 %v320_v19, %v317_v13  ;;  %670 = vst [vmem:[%s1418_s18 + $0xb0] sm:$0xff] %v514_v20 }
  0xe8   : > { %v457_v24 = vpop.f32.mrf.mxu1 }
  0xe9   : > { %956 = vst [vmem:[%s1425_s17 + $0x8] sm:$0xff] %v864_v23   ;;  %367 = vmatmul.f32.gmra.mxu0 %v241_v21  ;;  %427 = vmatmul.f32.gmra.mxu2 %v261_v22 }
  0xea   : > { %651 = vst [vmem:[%s1418_s18 + $0x18] sm:$0xff] %v457_v24 }
  0xeb   : > { %564 = vmatmul.f32.gmra.mxu3 %v261_v22  ;;  %504 = vmatmul.f32.gmra.mxu1 %v241_v21 }
  0xec   : > { %v380_v25 = vpop.f32.mrf.mxu2 }
  0xed   : > { %v914_v26 = vpack.c.bf16 %v380_v25, %v377_v18 }
  0xee   : > { %v323_v27 = vpop.f32.mrf.mxu0  ;;  %v517_v28 = vpop.f32.mrf.mxu3 }
  0xef   : > { %966 = vst [vmem:[%s1425_s17 + $0x58] sm:$0xff] %v914_v26  }
  0xf0   : > { %671 = vst [vmem:[%s1418_s18 + $0xb8] sm:$0xff] %v517_v28  ;;  %v460_v29 = vpop.f32.mrf.mxu1 }
  0xf1   : > { %652 = vst [vmem:[%s1418_s18 + $0x20] sm:$0xff] %v460_v29 }
  0xf4   : > { %v383_v30 = vpop.f32.mrf.mxu2 }
  0xf6   : > { %v326_v31 = vpop.f32.mrf.mxu0  ;;  %v520_v32 = vpop.f32.mrf.mxu3 }
  0xf7   : > { %v869_v33 = vpack.c.bf16 %v326_v31, %v323_v27  ;;  %672 = vst [vmem:[%s1418_s18 + $0xc0] sm:$0xff] %v520_v32 }
  0xf8   : > { %v463_v34 = vpop.f32.mrf.mxu1 }
  0xf9   : > { %957 = vst [vmem:[%s1425_s17 + $0x10] sm:$0xff] %v869_v33  }
  0xfa   : > { %653 = vst [vmem:[%s1418_s18 + $0x28] sm:$0xff] %v463_v34 }
  0xfc   : > { %v386_v35 = vpop.f32.mrf.mxu2 }
  0xfd   : > { %v919_v36 = vpack.c.bf16 %v386_v35, %v383_v30 }
  0xfe   : > { %v329_v37 = vpop.f32.mrf.mxu0  ;;  %v523_v38 = vpop.f32.mrf.mxu3 }
  0xff   : > { %967 = vst [vmem:[%s1425_s17 + $0x60] sm:$0xff] %v919_v36  }
 0x100   : > { %673 = vst [vmem:[%s1418_s18 + $0xc8] sm:$0xff] %v523_v38  ;;  %v466_v39 = vpop.f32.mrf.mxu1 }
 0x101   : > { %654 = vst [vmem:[%s1418_s18 + $0x30] sm:$0xff] %v466_v39 }
 0x104   : > { %v389_v40 = vpop.f32.mrf.mxu2 }
 0x106   : > { %v332_v41 = vpop.f32.mrf.mxu0  ;;  %v526_v42 = vpop.f32.mrf.mxu3 }
 0x107   : > { %v874_v43 = vpack.c.bf16 %v332_v41, %v329_v37  ;;  %674 = vst [vmem:[%s1418_s18 + $0xd0] sm:$0xff] %v526_v42 }
 0x108   : > { %v469_v44 = vpop.f32.mrf.mxu1 }
 0x109   : > { %958 = vst [vmem:[%s1425_s17 + $0x18] sm:$0xff] %v874_v43  }
 0x10a   : > { %655 = vst [vmem:[%s1418_s18 + $0x38] sm:$0xff] %v469_v44 }
 0x10c   : > { %v392_v45 = vpop.f32.mrf.mxu2 }
 0x10d   : > { %v924_v46 = vpack.c.bf16 %v392_v45, %v389_v40 }
 0x10e   : > { %v335_v47 = vpop.f32.mrf.mxu0  ;;  %v529_v48 = vpop.f32.mrf.mxu3 }
 0x10f   : > { %968 = vst [vmem:[%s1425_s17 + $0x68] sm:$0xff] %v924_v46  }
 0x110   : > { %675 = vst [vmem:[%s1418_s18 + $0xd8] sm:$0xff] %v529_v48  ;;  %v472_v49 = vpop.f32.mrf.mxu1 }
 0x111   : > { %656 = vst [vmem:[%s1418_s18 + $0x40] sm:$0xff] %v472_v49 }
 0x114   : > { %v395_v50 = vpop.f32.mrf.mxu2 }
 0x116   : > { %v338_v51 = vpop.f32.mrf.mxu0  ;;  %v532_v52 = vpop.f32.mrf.mxu3 }
 0x117   : > { %v879_v53 = vpack.c.bf16 %v338_v51, %v335_v47  ;;  %676 = vst [vmem:[%s1418_s18 + $0xe0] sm:$0xff] %v532_v52 }
 0x118   : > { %v475_v54 = vpop.f32.mrf.mxu1 }
 0x119   : > { %959 = vst [vmem:[%s1425_s17 + $0x20] sm:$0xff] %v879_v53  }
 0x11a   : > { %657 = vst [vmem:[%s1418_s18 + $0x48] sm:$0xff] %v475_v54 }
 0x11c   : > { %v398_v55 = vpop.f32.mrf.mxu2 }
 0x11d   : > { %v929_v56 = vpack.c.bf16 %v398_v55, %v395_v50 }
 0x11e   : > { %v341_v57 = vpop.f32.mrf.mxu0  ;;  %v535_v58 = vpop.f32.mrf.mxu3 }
 0x11f   : > { %969 = vst [vmem:[%s1425_s17 + $0x70] sm:$0xff] %v929_v56  }
 0x120   : > { %677 = vst [vmem:[%s1418_s18 + $0xe8] sm:$0xff] %v535_v58  ;;  %v478_v59 = vpop.f32.mrf.mxu1 }
 0x121   : > { %658 = vst [vmem:[%s1418_s18 + $0x50] sm:$0xff] %v478_v59 }
 0x124   : > { %v401_v60 = vpop.f32.mrf.mxu2 }
 0x126   : > { %v344_v61 = vpop.f32.mrf.mxu0  ;;  %v538_v62 = vpop.f32.mrf.mxu3 }
 0x127   : > { %v884_v63 = vpack.c.bf16 %v344_v61, %v341_v57  ;;  %678 = vst [vmem:[%s1418_s18 + $0xf0] sm:$0xff] %v538_v62 }
 0x128   : > { %v481_v0 = vpop.f32.mrf.mxu1 }
 0x129   : > { %960 = vst [vmem:[%s1425_s17 + $0x28] sm:$0xff] %v884_v63  }
 0x12a   : > { %659 = vst [vmem:[%s1418_s18 + $0x58] sm:$0xff] %v481_v0 }
 0x12c   : > { %v404_v1 = vpop.f32.mrf.mxu2 }
 0x12d   : > { %v934_v2 = vpack.c.bf16 %v404_v1, %v401_v60 }
 0x12e   : > { %v347_v3 = vpop.f32.mrf.mxu0  ;;  %v541_v4 = vpop.f32.mrf.mxu3 }
 0x12f   : > { %970 = vst [vmem:[%s1425_s17 + $0x78] sm:$0xff] %v934_v2  }
 0x130   : > { %679 = vst [vmem:[%s1418_s18 + $0xf8] sm:$0xff] %v541_v4  ;;  %v484_v5 = vpop.f32.mrf.mxu1 }
 0x131   : > { %660 = vst [vmem:[%s1418_s18 + $0x60] sm:$0xff] %v484_v5 }
 0x134   : > { %v407_v6 = vpop.f32.mrf.mxu2 }
 0x136   : > { %v350_v7 = vpop.f32.mrf.mxu0  ;;  %v544_v8 = vpop.f32.mrf.mxu3 }
 0x137   : > { %v889_v9 = vpack.c.bf16 %v350_v7, %v347_v3  ;;  %680 = vst [vmem:[%s1418_s18 + $0x100] sm:$0xff] %v544_v8 }
 0x138   : > { %v487_v10 = vpop.f32.mrf.mxu1 }
 0x139   : > { %961 = vst [vmem:[%s1425_s17 + $0x30] sm:$0xff] %v889_v9  }
 0x13a   : > { %661 = vst [vmem:[%s1418_s18 + $0x68] sm:$0xff] %v487_v10 }
 0x13c   : > { %v410_v11 = vpop.f32.mrf.mxu2 }
 0x13d   : > { %v939_v12 = vpack.c.bf16 %v410_v11, %v407_v6 }
 0x13e   : > { %v353_v13 = vpop.f32.mrf.mxu0  ;;  %v547_v14 = vpop.f32.mrf.mxu3 }
 0x13f   : > { %971 = vst [vmem:[%s1425_s17 + $0x80] sm:$0xff] %v939_v12  }
 0x140   : > { %681 = vst [vmem:[%s1418_s18 + $0x108] sm:$0xff] %v547_v14  ;;  %v490_v15 = vpop.f32.mrf.mxu1 }
 0x141   : > { %662 = vst [vmem:[%s1418_s18 + $0x70] sm:$0xff] %v490_v15 }
 0x144   : > { %v413_v16 = vpop.f32.mrf.mxu2 }
 0x146   : > { %v356_v17 = vpop.f32.mrf.mxu0  ;;  %v550_v18 = vpop.f32.mrf.mxu3 }
 0x147   : > { %v894_v19 = vpack.c.bf16 %v356_v17, %v353_v13  ;;  %682 = vst [vmem:[%s1418_s18 + $0x110] sm:$0xff] %v550_v18 }
 0x148   : > { %v493_v20 = vpop.f32.mrf.mxu1 }
 0x149   : > { %962 = vst [vmem:[%s1425_s17 + $0x38] sm:$0xff] %v894_v19  }
 0x14a   : > { %663 = vst [vmem:[%s1418_s18 + $0x78] sm:$0xff] %v493_v20 }
 0x14c   : > { %v416_v21 = vpop.f32.mrf.mxu2 }
 0x14d   : > { %v944_v22 = vpack.c.bf16 %v416_v21, %v413_v16 }
 0x14e   : > { %v359_v23 = vpop.f32.mrf.mxu0  ;;  %v553_v24 = vpop.f32.mrf.mxu3 }
 0x14f   : > { %972 = vst [vmem:[%s1425_s17 + $0x88] sm:$0xff] %v944_v22  }
 0x150   : > { %683 = vst [vmem:[%s1418_s18 + $0x118] sm:$0xff] %v553_v24  ;;  %v496_v25 = vpop.f32.mrf.mxu1 }
 0x151   : > { %664 = vst [vmem:[%s1418_s18 + $0x80] sm:$0xff] %v496_v25 }
 0x154   : > { %v419_v26 = vpop.f32.mrf.mxu2 }
 0x156   : > { %v362_v27 = vpop.f32.mrf.mxu0  ;;  %v556_v28 = vpop.f32.mrf.mxu3 }
 0x157   : > { %v899_v29 = vpack.c.bf16 %v362_v27, %v359_v23  ;;  %684 = vst [vmem:[%s1418_s18 + $0x120] sm:$0xff] %v556_v28 }
 0x158   : > { %v499_v30 = vpop.f32.mrf.mxu1 }
 0x159   : > { %963 = vst [vmem:[%s1425_s17 + $0x40] sm:$0xff] %v899_v29  }
 0x15a   : > { %665 = vst [vmem:[%s1418_s18 + $0x88] sm:$0xff] %v499_v30 }
 0x15c   : > { %v422_v31 = vpop.f32.mrf.mxu2 }
 0x15d   : > { %v949_v32 = vpack.c.bf16 %v422_v31, %v419_v26 }
 0x15e   : > { %v365_v33 = vpop.f32.mrf.mxu0  ;;  %v559_v34 = vpop.f32.mrf.mxu3 }
 0x15f   : > { %973 = vst [vmem:[%s1425_s17 + $0x90] sm:$0xff] %v949_v32  }
 0x160   : > { %685 = vst [vmem:[%s1418_s18 + $0x128] sm:$0xff] %v559_v34  ;;  %v502_v35 = vpop.f32.mrf.mxu1 }
 0x161   : > { %666 = vst [vmem:[%s1418_s18 + $0x90] sm:$0xff] %v502_v35 }
 0x164   : > { %v425_v36 = vpop.f32.mrf.mxu2 }
 0x166   : > { %v368_v37 = vpop.f32.mrf.mxu0  ;;  %v562_v38 = vpop.f32.mrf.mxu3 }
 0x167   : > { %v904_v39 = vpack.c.bf16 %v368_v37, %v365_v33  ;;  %686 = vst [vmem:[%s1418_s18 + $0x130] sm:$0xff] %v562_v38 }
 0x168   : > { %v505_v40 = vpop.f32.mrf.mxu1 }
 0x169   : > { %964 = vst [vmem:[%s1425_s17 + $0x48] sm:$0xff] %v904_v39  }
 0x16a   : > { %667 = vst [vmem:[%s1418_s18 + $0x98] sm:$0xff] %v505_v40 }
 0x16c   : > { %v428_v41 = vpop.f32.mrf.mxu2 }
 0x16d   : > { %v954_v42 = vpack.c.bf16 %v428_v41, %v425_v36 }
 0x16e   : > { %v565_v43 = vpop.f32.mrf.mxu3 }
 0x16f   : > { %974 = vst [vmem:[%s1425_s17 + $0x98] sm:$0xff] %v954_v42  }
 0x170   : > { %687 = vst [vmem:[%s1418_s18 + $0x138] sm:$0xff] %v565_v43 }
 0x171   : > { %1167 = shalt.err (!%p1164_p10)
}
 0x172   : > { %s1249_s18 = smov 64   ;;  %s1250_s17 = smov 4  }
 0x173   : > { %1016 = dma.vmem_to_hbm [thread:$0]  (%p1340_p7), %s1496_s29, 2560, %s709_s6, %s689_s11, %s1249_s18, %s1249_s18, %s1250_s17  }
 0x174   : > { %s694_s28 = scalar_lea.sflag [#allocation9], %s1366_s10  ;;  %s1182_s30 = sshra.s32 %s1501_s8, 4  ;;  %s1183_s30 = int_to_ptr.hbm [resolvable:$true] %s1182_s30 }
 0x175   : > { %s1184_s7 = scalar_lea.hbm %s1183_s30, 320  ;;  %s1188_s25 = scalar_lea.hbm %s1552_s3, 640 }
 0x176   : > { %p1185_p12 = scmp.ne.s32.totalorder %s1183_s30, %s1184_s7  ;;  %p1189_p3 = scmp.lt.s32.totalorder %s1183_s30, %s1552_s3 }
 0x177   : > { %p1190_p5 = scmp.lt.s32.totalorder %s1188_s25, %s1184_s7 }
 0x178   : > { %p1186_p13 = pnand %p1185_p12, %p1340_p7 }
 0x179   : > { %p1191_p1 = por %p1190_p5, %p1189_p3 }
 0x17a   : > { %p1187_p0 = pneg %p1186_p13 }
 0x17c   : > { %p1192_p4 = pnand %p1191_p1, %p1187_p0 }
 0x17e   : > { %1195 = shalt.err (!%p1192_p4)
}
 0x17f   : > { %s1251_s10 = smov 128   ;;  %s1252_s29 = smov 8  }
 0x180   : > { %1017 = dma.vmem_to_hbm [thread:$0]  (%p1340_p7), %s1499_s16, 5120, %s1501_s8, %s694_s28, %s1251_s10, %s1251_s10, %s1252_s29  }
 0x181 PF: > { %s740_s6 = sand.u32 1, %s1230_s12   ;;  %p1558_p8 = scmp.ge.s32.totalorder %s1242_s15, 2 }
 0x182   : > { %s741_s11 = scalar_lea.sflag [#allocation4], %s740_s6 }
 0x183   : > { %p1029_p11 = pnand %p1558_p8, %p1308_p6 }
 0x185   : > { %p1030_p9 = pneg %p1029_p11 }
 0x187   : > { %1221 = dma.done.wait (%p1030_p9), %s741_s11, 2560  }
 0x188   : > { %1223 = vsyncadd (%p1030_p9), %s741_s11, 4294964736  ;;  %s751_s22 = scalar_lea.sflag [#allocation9], %s740_s6 }
 0x189   : > { %1225 = dma.done.wait (%p1030_p9), %s751_s22, 5120  }
 0x18a   : > { %1227 = vsyncadd (%p1030_p9), %s751_s22, 4294962176  ;;  %p21_p7 = scmp.ge.s32.totalorder %s1326_s26, 4   ;;  %s1559_s12 = smov %s1234_s13 }
 0x18b   : > { %s1560_s13 = smov %s1238_s14  ;;  %s1561_s14 = smov %s1336_s4 }
 0x18c   : > { %s1562_s15 = smov %s1326_s26  ;;  %23 = sbr.rel (!%p21_p7) target bundleno = 8 (0x8), region = 94 }
 0x191   :  { %757 = vsyncpa [#allocation3], 1 }
 0x192   :  { %759 = vsyncpa [#allocation3 + $0x1], 1 }
 0x193   :  { %760 = vsyncpa [#allocation6], 1 }
 0x194   :  { %761 = vsyncpa [#allocation4], 1 }
 0x195   :  { %763 = vsyncpa [#allocation4 + $0x1], 1 }
 0x196   :  { %764 = vsyncpa [#allocation9], 1 }
 0x197   :  { %766 = vsyncpa [#allocation9 + $0x1], 1 }

</bundles_post_ra>
